<compile_context>
chip_gen: v7x
topology: tpu7x:2x2x1
jax: 0.10.0
libtpu: 0.0.40
codegen_flags: <defaults>
</compile_context>

<pallas_src>
import functools

import jax
import jax.numpy as jnp
from jax.experimental import pallas as pl
from jax.experimental.pallas import tpu as pltpu

LANE = 128
SUBLANE = 8


def _round_up(x, m):
    return ((x + m - 1) // m) * m


def _pad2d(a, rows, cols):
    r, c = a.shape
    if r == rows and c == cols:
        return a
    return jnp.pad(a, ((0, rows - r), (0, cols - c)))


def mlp_kernel(x_ref, w1_ref, b1_ref, w2_ref, b2_ref, w3_ref, b3_ref,
               w4_ref, b4_ref, o_ref):
    """Fused 4-layer MLP forward on one (tm, d_in) batch tile.

    Matmul inputs are cast to the weight dtype (bf16 on the fast path — this
    is bf16 *activations*, not just bf16 weights) and accumulate in f32 on the
    MXU; bias-add / ReLU run in f32 on the VPU.
    """
    mat_dtype = w1_ref.dtype
    x = x_ref[...].astype(mat_dtype)

    h = jnp.dot(x, w1_ref[...], preferred_element_type=jnp.float32) + b1_ref[...]
    h = jnp.maximum(h, 0.0)

    h = jnp.dot(h.astype(mat_dtype), w2_ref[...],
                preferred_element_type=jnp.float32) + b2_ref[...]
    h = jnp.maximum(h, 0.0)

    h = jnp.dot(h.astype(mat_dtype), w3_ref[...],
                preferred_element_type=jnp.float32) + b3_ref[...]
    h = jnp.maximum(h, 0.0)

    out = jnp.dot(h.astype(mat_dtype), w4_ref[...],
                  preferred_element_type=jnp.float32) + b4_ref[...]
    o_ref[...] = out.astype(o_ref.dtype)


@functools.partial(jax.jit, static_argnames=("use_bf16", "tile_m"))
def mlp_forward(x, params, *, use_bf16=True, tile_m=2048):
    """Run the fused MLP Pallas kernel.

    x: (N, n_input_feature), f32 or bf16 (bf16 x is read directly — no
       wrapper-side cast — halving the dominant HBM read stream).
    params: dict with w1..w4 as (in, out) f32 and b1..b4 as (1, out) f32.
    Output dtype matches x's dtype.
    """
    n, d_in = x.shape
    d_hidden = params["w1"].shape[1]        # 128
    d_small = params["w3"].shape[1]         # 8
    n_out = params["w4"].shape[1]

    # Only the tiny fc3/output weights get zero-padded (free: resident + tiny);
    # activations and the output stream at their natural widths.
    d_s_p = _round_up(d_small, LANE)        # 8 -> 128

    mat_dtype = jnp.bfloat16 if use_bf16 else jnp.float32

    w1 = params["w1"].astype(mat_dtype)                           # (d_in, 128)
    b1 = params["b1"]
    w2 = params["w2"].astype(mat_dtype)                           # (128, 128)
    b2 = params["b2"]
    w3 = _pad2d(params["w3"], d_hidden, d_s_p).astype(mat_dtype)  # (128, 128)
    b3 = _pad2d(params["b3"], 1, d_s_p)
    w4 = _pad2d(params["w4"], d_s_p, n_out).astype(mat_dtype)     # (128, n_out)
    b4 = params["b4"]

    # Batch tiling: big tiles amortize the ~0.35us/step overhead, but cap at
    # ~ceil(n/2) so the grid has >=2 steps whenever possible (keeps both v7x
    # TensorCores busy).  tm is always a multiple of 8 (sublane); Pallas masks
    # the ragged last block's stores, so no batch padding is needed.
    half = _round_up(max(1, -(-n // 2)), SUBLANE)
    tm = _round_up(max(SUBLANE, min(tile_m, half)), SUBLANE)
    grid = (pl.cdiv(n, tm),)

    const_spec = lambda a: pl.BlockSpec(a.shape, lambda i: (0, 0))

    flops = 2 * n * (d_in * d_hidden + d_hidden * d_hidden
                     + d_hidden * d_s_p + d_s_p * n_out)
    weight_bytes = sum(int(a.size) * a.dtype.itemsize
                       for a in (w1, b1, w2, b2, w3, b3, w4, b4))
    bytes_accessed = (int(x.size) * x.dtype.itemsize
                      + int(n * n_out) * x.dtype.itemsize
                      + weight_bytes)

    out = pl.pallas_call(
        mlp_kernel,
        out_shape=jax.ShapeDtypeStruct((n, n_out), x.dtype),
        grid=grid,
        in_specs=[
            pl.BlockSpec((tm, d_in), lambda i: (i, 0)),  # activations stream
            const_spec(w1), const_spec(b1),              # weights stay resident
            const_spec(w2), const_spec(b2),
            const_spec(w3), const_spec(b3),
            const_spec(w4), const_spec(b4),
        ],
        out_specs=pl.BlockSpec((tm, n_out), lambda i: (i, 0)),
        compiler_params=pltpu.CompilerParams(
            dimension_semantics=("parallel",),           # shard batch over TCs (v7x)
            vmem_limit_bytes=32 * 1024 * 1024),
        cost_estimate=pl.CostEstimate(
            flops=flops, transcendentals=0, bytes_accessed=bytes_accessed),
    )(x, w1, b1, w2, b2, w3, b3, w4, b4)
    return out


def init_params(key, n_input_feature, n_output):
    """Deterministic parameter init (matches torch.nn.Linear shapes, transposed)."""
    dims = [(n_input_feature, 128), (128, 128), (128, 8), (8, n_output)]
    params = {}
    for i, (d_in, d_out) in enumerate(dims, start=1):
        key, kw, kb = jax.random.split(key, 3)
        # uniform(-1/sqrt(fan_in), 1/sqrt(fan_in)) like PyTorch's default Linear init
        bound = 1.0 / jnp.sqrt(jnp.float32(d_in))
        params[f"w{i}"] = jax.random.uniform(
            kw, (d_in, d_out), jnp.float32, -bound, bound)
        params[f"b{i}"] = jax.random.uniform(
            kb, (1, d_out), jnp.float32, -bound, bound)
    return params


def reference_forward(x, params):
    h = jnp.maximum(x @ params["w1"] + params["b1"], 0.0)
    h = jnp.maximum(h @ params["w2"] + params["b2"], 0.0)
    h = jnp.maximum(h @ params["w3"] + params["b3"], 0.0)
    return h @ params["w4"] + params["b4"]


if __name__ == "__main__":
    N = 8                 # batch
    N_INPUT_FEATURE = 64  # n_input_feature
    N_OUTPUT = 10         # n_output (number of classes)

    key = jax.random.PRNGKey(0)
    key, kx, kx2 = jax.random.split(key, 3)
    params = init_params(key, N_INPUT_FEATURE, N_OUTPUT)

    # --- Case 1: small aligned batch --------------------------------------
    x = jax.random.normal(kx, (N, N_INPUT_FEATURE), jnp.float32)
    ref = reference_forward(x, params)

    # Fast path: bf16 matmul inputs (weights AND activations), f32 accumulate.
    out_bf16 = jax.block_until_ready(mlp_forward(x, params, use_bf16=True))
    assert out_bf16.shape == (N, N_OUTPUT)
    assert jnp.allclose(out_bf16, ref, atol=5e-2, rtol=5e-2)

    # Validation-only full-f32 path: must match tightly.
    out_f32 = jax.block_until_ready(mlp_forward(x, params, use_bf16=False))
    assert out_f32.shape == (N, N_OUTPUT)
    assert jnp.allclose(out_f32, ref, atol=1e-4, rtol=1e-4)

    # --- Case 2: ragged batch (not a multiple of the tile) -----------------
    # Exercises pl.cdiv grid + masked stores on the partial last block.
    N2 = 20
    x2 = jax.random.normal(kx2, (N2, N_INPUT_FEATURE), jnp.float32)
    ref2 = reference_forward(x2, params)

    out2_f32 = jax.block_until_ready(mlp_forward(x2, params, use_bf16=False))
    assert out2_f32.shape == (N2, N_OUTPUT)
    assert jnp.allclose(out2_f32, ref2, atol=1e-4, rtol=1e-4)

    out2_bf16 = jax.block_until_ready(mlp_forward(x2, params, use_bf16=True))
    assert jnp.allclose(out2_bf16, ref2, atol=5e-2, rtol=5e-2)

    # --- Case 3: producer-supplied bf16 input (halves the x read stream) ---
    out_xb = jax.block_until_ready(
        mlp_forward(x.astype(jnp.bfloat16), params, use_bf16=True))
    assert out_xb.shape == (N, N_OUTPUT) and out_xb.dtype == jnp.bfloat16
    assert jnp.allclose(out_xb.astype(jnp.float32), ref, atol=1e-1, rtol=1e-1)

    print("KERNEL_OK")
</pallas_src>

<mosaic_0001>
module attributes {stable_mosaic.version = 11 : i64} {
  func.func @mlp_kernel(%arg0: i32, %arg1: memref<8x64xf32, #tpu.memory_space<vmem>>, %arg2: memref<64x128xbf16, #tpu.memory_space<vmem>>, %arg3: memref<1x128xf32, #tpu.memory_space<vmem>>, %arg4: memref<128x128xbf16, #tpu.memory_space<vmem>>, %arg5: memref<1x128xf32, #tpu.memory_space<vmem>>, %arg6: memref<128x128xbf16, #tpu.memory_space<vmem>>, %arg7: memref<1x128xf32, #tpu.memory_space<vmem>>, %arg8: memref<128x10xbf16, #tpu.memory_space<vmem>>, %arg9: memref<1x10xf32, #tpu.memory_space<vmem>>, %arg10: memref<8x10xf32, #tpu.memory_space<vmem>>) attributes {dimension_semantics = [#tpu.dimension_semantics<parallel>], iteration_bounds = array<i64: 1>, scalar_prefetch = 0 : i64, scratch_operands = 0 : i64, tpu.core_type = #tpu.core_type<tc>, window_params = [{transform_indices = @transform_0, window_bounds = array<i64: 8, 64>}, {pipeline_mode = #tpu.pipeline_mode<synchronous>, transform_indices = @transform_1, window_bounds = array<i64: 64, 128>}, {pipeline_mode = #tpu.pipeline_mode<synchronous>, transform_indices = @transform_2, window_bounds = array<i64: 1, 128>}, {pipeline_mode = #tpu.pipeline_mode<synchronous>, transform_indices = @transform_3, window_bounds = array<i64: 128, 128>}, {pipeline_mode = #tpu.pipeline_mode<synchronous>, transform_indices = @transform_4, window_bounds = array<i64: 1, 128>}, {pipeline_mode = #tpu.pipeline_mode<synchronous>, transform_indices = @transform_5, window_bounds = array<i64: 128, 128>}, {pipeline_mode = #tpu.pipeline_mode<synchronous>, transform_indices = @transform_6, window_bounds = array<i64: 1, 128>}, {pipeline_mode = #tpu.pipeline_mode<synchronous>, transform_indices = @transform_7, window_bounds = array<i64: 128, 10>}, {pipeline_mode = #tpu.pipeline_mode<synchronous>, transform_indices = @transform_8, window_bounds = array<i64: 1, 10>}, {transform_indices = @transform_9, window_bounds = array<i64: 8, 10>}]} {
    %c0 = arith.constant 0 : index
    %c0_0 = arith.constant 0 : index
    %0 = vector.load %arg1[%c0, %c0_0] : memref<8x64xf32, #tpu.memory_space<vmem>>, vector<8x64xf32>
    %1 = arith.truncf %0 : vector<8x64xf32> to vector<8x64xbf16>
    %c0_1 = arith.constant 0 : index
    %c0_2 = arith.constant 0 : index
    %2 = vector.load %arg2[%c0_1, %c0_2] : memref<64x128xbf16, #tpu.memory_space<vmem>>, vector<64x128xbf16>
    %cst = arith.constant dense<0.000000e+00> : vector<8x128xf32>
    %3 = tpu.matmul %1, %2, %cst {dimension_numbers = #tpu.dot_dimension_numbers<[1], [0], [0], [1], [0, 0, 1, 1], [], []>} : vector<8x64xbf16>, vector<64x128xbf16>, vector<8x128xf32> -> vector<8x128xf32>
    %c0_3 = arith.constant 0 : index
    %c0_4 = arith.constant 0 : index
    %4 = vector.load %arg3[%c0_3, %c0_4] : memref<1x128xf32, #tpu.memory_space<vmem>>, vector<1x128xf32>
    %5 = vector.broadcast %4 : vector<1x128xf32> to vector<8x128xf32>
    %6 = arith.addf %3, %5 : vector<8x128xf32>
    %cst_5 = arith.constant 0.000000e+00 : f32
    %7 = vector.broadcast %cst_5 : f32 to vector<8x128xf32>
    %8 = arith.maximumf %6, %7 : vector<8x128xf32>
    %9 = arith.truncf %8 : vector<8x128xf32> to vector<8x128xbf16>
    %c0_6 = arith.constant 0 : index
    %c0_7 = arith.constant 0 : index
    %10 = vector.load %arg4[%c0_6, %c0_7] : memref<128x128xbf16, #tpu.memory_space<vmem>>, vector<128x128xbf16>
    %cst_8 = arith.constant dense<0.000000e+00> : vector<8x128xf32>
    %11 = tpu.matmul %9, %10, %cst_8 {dimension_numbers = #tpu.dot_dimension_numbers<[1], [0], [0], [1], [0, 0, 1, 1], [], []>} : vector<8x128xbf16>, vector<128x128xbf16>, vector<8x128xf32> -> vector<8x128xf32>
    %c0_9 = arith.constant 0 : index
    %c0_10 = arith.constant 0 : index
    %12 = vector.load %arg5[%c0_9, %c0_10] : memref<1x128xf32, #tpu.memory_space<vmem>>, vector<1x128xf32>
    %13 = vector.broadcast %12 : vector<1x128xf32> to vector<8x128xf32>
    %14 = arith.addf %11, %13 : vector<8x128xf32>
    %cst_11 = arith.constant 0.000000e+00 : f32
    %15 = vector.broadcast %cst_11 : f32 to vector<8x128xf32>
    %16 = arith.maximumf %14, %15 : vector<8x128xf32>
    %17 = arith.truncf %16 : vector<8x128xf32> to vector<8x128xbf16>
    %c0_12 = arith.constant 0 : index
    %c0_13 = arith.constant 0 : index
    %18 = vector.load %arg6[%c0_12, %c0_13] : memref<128x128xbf16, #tpu.memory_space<vmem>>, vector<128x128xbf16>
    %cst_14 = arith.constant dense<0.000000e+00> : vector<8x128xf32>
    %19 = tpu.matmul %17, %18, %cst_14 {dimension_numbers = #tpu.dot_dimension_numbers<[1], [0], [0], [1], [0, 0, 1, 1], [], []>} : vector<8x128xbf16>, vector<128x128xbf16>, vector<8x128xf32> -> vector<8x128xf32>
    %c0_15 = arith.constant 0 : index
    %c0_16 = arith.constant 0 : index
    %20 = vector.load %arg7[%c0_15, %c0_16] : memref<1x128xf32, #tpu.memory_space<vmem>>, vector<1x128xf32>
    %21 = vector.broadcast %20 : vector<1x128xf32> to vector<8x128xf32>
    %22 = arith.addf %19, %21 : vector<8x128xf32>
    %cst_17 = arith.constant 0.000000e+00 : f32
    %23 = vector.broadcast %cst_17 : f32 to vector<8x128xf32>
    %24 = arith.maximumf %22, %23 : vector<8x128xf32>
    %25 = arith.truncf %24 : vector<8x128xf32> to vector<8x128xbf16>
    %c0_18 = arith.constant 0 : index
    %c0_19 = arith.constant 0 : index
    %26 = vector.load %arg8[%c0_18, %c0_19] : memref<128x10xbf16, #tpu.memory_space<vmem>>, vector<128x10xbf16>
    %cst_20 = arith.constant dense<0.000000e+00> : vector<8x10xf32>
    %27 = tpu.matmul %25, %26, %cst_20 {dimension_numbers = #tpu.dot_dimension_numbers<[1], [0], [0], [1], [0, 0, 1, 1], [], []>} : vector<8x128xbf16>, vector<128x10xbf16>, vector<8x10xf32> -> vector<8x10xf32>
    %c0_21 = arith.constant 0 : index
    %c0_22 = arith.constant 0 : index
    %28 = vector.load %arg9[%c0_21, %c0_22] : memref<1x10xf32, #tpu.memory_space<vmem>>, vector<1x10xf32>
    %29 = vector.broadcast %28 : vector<1x10xf32> to vector<8x10xf32>
    %30 = arith.addf %27, %29 : vector<8x10xf32>
    %c0_23 = arith.constant 0 : index
    %c0_24 = arith.constant 0 : index
    %31 = vector.load %arg10[%c0_23, %c0_24] : memref<8x10xf32, #tpu.memory_space<vmem>>, vector<8x10xf32>
    tpu.vector_store %arg10[%c0_23, %c0_24], %30 {strides = array<i32>} : memref<8x10xf32, #tpu.memory_space<vmem>>, vector<8x10xf32>,
    return
  }
  func.func @transform_0(%arg0: i32) -> (i32, i32) {
    %c0_i32 = arith.constant 0 : i32
    %c0_i32_0 = arith.constant 0 : i32
    return %arg0, %c0_i32 : i32, i32
  }
  func.func @transform_1(%arg0: i32) -> (i32, i32) {
    %c0_i32 = arith.constant 0 : i32
    %c0_i32_0 = arith.constant 0 : i32
    %c0_i32_1 = arith.constant 0 : i32
    return %c0_i32, %c0_i32_0 : i32, i32
  }
  func.func @transform_2(%arg0: i32) -> (i32, i32) {
    %c0_i32 = arith.constant 0 : i32
    %c0_i32_0 = arith.constant 0 : i32
    %c0_i32_1 = arith.constant 0 : i32
    return %c0_i32, %c0_i32_0 : i32, i32
  }
  func.func @transform_3(%arg0: i32) -> (i32, i32) {
    %c0_i32 = arith.constant 0 : i32
    %c0_i32_0 = arith.constant 0 : i32
    %c0_i32_1 = arith.constant 0 : i32
    return %c0_i32, %c0_i32_0 : i32, i32
  }
  func.func @transform_4(%arg0: i32) -> (i32, i32) {
    %c0_i32 = arith.constant 0 : i32
    %c0_i32_0 = arith.constant 0 : i32
    %c0_i32_1 = arith.constant 0 : i32
    return %c0_i32, %c0_i32_0 : i32, i32
  }
  func.func @transform_5(%arg0: i32) -> (i32, i32) {
    %c0_i32 = arith.constant 0 : i32
    %c0_i32_0 = arith.constant 0 : i32
    %c0_i32_1 = arith.constant 0 : i32
    return %c0_i32, %c0_i32_0 : i32, i32
  }
  func.func @transform_6(%arg0: i32) -> (i32, i32) {
    %c0_i32 = arith.constant 0 : i32
    %c0_i32_0 = arith.constant 0 : i32
    %c0_i32_1 = arith.constant 0 : i32
    return %c0_i32, %c0_i32_0 : i32, i32
  }
  func.func @transform_7(%arg0: i32) -> (i32, i32) {
    %c0_i32 = arith.constant 0 : i32
    %c0_i32_0 = arith.constant 0 : i32
    %c0_i32_1 = arith.constant 0 : i32
    return %c0_i32, %c0_i32_0 : i32, i32
  }
  func.func @transform_8(%arg0: i32) -> (i32, i32) {
    %c0_i32 = arith.constant 0 : i32
    %c0_i32_0 = arith.constant 0 : i32
    %c0_i32_1 = arith.constant 0 : i32
    return %c0_i32, %c0_i32_0 : i32, i32
  }
  func.func @transform_9(%arg0: i32) -> (i32, i32) {
    %c0_i32 = arith.constant 0 : i32
    %c0_i32_0 = arith.constant 0 : i32
    return %arg0, %c0_i32 : i32, i32
  }
}

</mosaic_0001>

<bundles_post_ra>
// kernel: mlp_forward.1
= control target key start
LH: loop header
LB: loop body
LE: loop exit
PB: predicated region body
PF: predicated region fallthrough
CT: control target
= control target key end

     0   :  { %v666_v1 = vmov 0.0   ;;  %vm667_vm0 = vmmov 0   ;;  %vm75_vm1 = vcmask 523264   ;;  %s866_s0 = inlined_call_operand.vmem [shape: f32[8,64], index: 0, kind: input, shape index: {}]   ;;  %s867_s1 = inlined_call_operand.vmem [shape: bf16[64,128], index: 1, kind: input, shape index: {}]   ;;  %s868_s2 = inlined_call_operand.vmem [shape: f32[1,128], index: 2, kind: input, shape index: {}]   ;;  %s869_s3 = inlined_call_operand.vmem [shape: bf16[128,128], index: 3, kind: input, shape index: {}]   ;;  %s870_s4 = inlined_call_operand.vmem [shape: f32[1,128], index: 4, kind: input, shape index: {}]   ;;  %s871_s5 = inlined_call_operand.vmem [shape: bf16[128,128], index: 5, kind: input, shape index: {}]   ;;  %s872_s6 = inlined_call_operand.vmem [shape: f32[1,128], index: 6, kind: input, shape index: {}]   ;;  %s873_s7 = inlined_call_operand.vmem [shape: bf16[128,10], index: 7, kind: input, shape index: {}]   ;;  %s874_s8 = inlined_call_operand.vmem [shape: f32[1,10], index: 8, kind: input, shape index: {}]   ;;  %s875_s9 = inlined_call_operand.hbm [shape: f32[8,10], index: 9, kind: output, shape index: {}]  }
   0x1   :  { %v614_v0 = vld [vmem:[%s867_s1] sm:$0xff]   ;;  %539 = vmatprep.subr.bf16.mxu0 %v666_v1  ;;  %551 = vmatprep.subr.bf16.mxu1 %v666_v1  ;;  %v615_v2 = vld [vmem:[%s867_s1 + $0x8] sm:$0xff]   ;;  %v616_v4 = vld [vmem:[%s867_s1 + $0x10] sm:$0xff]  }
   0x2   :  { %540 = vmatpush3.bf16.msra.mxu0 %v614_v0  ;;  %547 = vmatprep.mubr.msk.bf16.mxu0 %vm667_vm0, %v666_v1  ;;  %v618_v3 = vld [vmem:[%s869_s3] sm:$0xff]   ;;  %v619_v5 = vld [vmem:[%s869_s3 + $0x8] sm:$0xff]   ;;  %v617_v6 = vld [vmem:[%s867_s1 + $0x18] sm:$0xff]  }
   0x3   :  { %541 = vmatprep.subr.bf16.mxu0 %v666_v1  ;;  %567 = vmatprep.mubr.msk.bf16.mxu1 %vm667_vm0, %v666_v1  ;;  %v34_v7 = vld [vmem:[%s866_s0] sm:$0xff]  ;;  %v620_v8 = vld [vmem:[%s869_s3 + $0x10] sm:$0xff]   ;;  %v621_v10 = vld [vmem:[%s869_s3 + $0x18] sm:$0xff]  }
   0x4   :  { %552 = vmatpush3.bf16.msra.mxu1 %v618_v3  ;;  %v35_v9 = vpack.c.bf16 %v34_v7, %v34_v7  ;;  %v622_v11 = vld [vmem:[%s869_s3 + $0x20] sm:$0xff]  }
   0x5   :  { %553 = vmatprep.subr.bf16.mxu1 %v666_v1 }
   0x6   :  { %542 = vmatpush3.bf16.msra.mxu0 %v615_v2 }
   0x7   :  { %543 = vmatprep.subr.bf16.mxu0 %v666_v1 }
   0x8   :  { %554 = vmatpush3.bf16.msra.mxu1 %v619_v5 }
   0x9   :  { %555 = vmatprep.subr.bf16.mxu1 %v666_v1 }
   0xa   :  { %544 = vmatpush3.bf16.msra.mxu0 %v616_v4 }
   0xb   :  { %545 = vmatprep.subr.bf16.mxu0 %v666_v1 }
   0xc   :  { %556 = vmatpush3.bf16.msra.mxu1 %v620_v8 }
   0xd   :  { %557 = vmatprep.subr.bf16.mxu1 %v666_v1 }
   0xe   :  { %546 = vmatpush3.bf16.msra.mxu0 %v617_v6 }
   0xf   :  { %571 = vmatprep.subr.bf16.mxu0 %v666_v1 }
  0x10   :  { %558 = vmatpush3.bf16.msra.mxu1 %v621_v10 }
  0x11   :  { %548 = vmatmul.mubr.msk.bf16.vlgmr.msra.gmra.mrb[0].mxu0 %vm75_vm1, %v35_v9  ;;  %559 = vmatprep.subr.bf16.mxu1 %v666_v1 }
  0x12   :  { %587 = vmatprep.mubr.msk.bf16.mxu0 %vm667_vm0, %v666_v1 }
  0x13   :  { %14 = vsyncpa [#allocation3], 0  ;;  %v623_v12 = vld [vmem:[%s869_s3 + $0x28] sm:$0xff]   ;;  %v624_v13 = vld [vmem:[%s869_s3 + $0x30] sm:$0xff]   ;;  %s668_s24 = smov [#allocation2]   ;;  %vm458_vm2 = vcmask 80896  }
  0x14   :  { %560 = vmatpush3.bf16.msra.mxu1 %v622_v11  ;;  %v625_v14 = vld [vmem:[%s869_s3 + $0x38] sm:$0xff]   ;;  %v626_v15 = vld [vmem:[%s871_s5] sm:$0xff]   ;;  %v627_v16 = vld [vmem:[%s871_s5 + $0x8] sm:$0xff]   ;;  %s466_s25 = sshll.u32 %s668_s24, 4  ;;  %s467_s25 = int_to_ptr.vmem [resolvable:$true] %s466_s25 }
  0x15   :  { %561 = vmatprep.subr.bf16.mxu1 %v666_v1  ;;  %572 = vmatpush3.bf16.msra.mxu0 %v626_v15  ;;  %v628_v17 = vld [vmem:[%s871_s5 + $0x10] sm:$0xff]   ;;  %v629_v18 = vld [vmem:[%s871_s5 + $0x18] sm:$0xff]   ;;  %v630_v19 = vld [vmem:[%s871_s5 + $0x20] sm:$0xff]   ;;  %p647_p1 = scmp.lt.s32.totalorder %s467_s25, %s467_s25 }
  0x16   :  { %573 = vmatprep.subr.bf16.mxu0 %v666_v1  ;;  %v631_v20 = vld [vmem:[%s871_s5 + $0x28] sm:$0xff]   ;;  %v474_v21 = vld [vmem:[%s868_s2] ss:$0 sm:$0xff]  ;;  %v632_v29 = vld [vmem:[%s871_s5 + $0x30] sm:$0xff]  }
  0x17   :  { %v633_v30 = vld [vmem:[%s871_s5 + $0x38] sm:$0xff]   ;;  %v634_v31 = vld [vmem:[%s873_s7] sm:$0xff]   ;;  %v635_v32 = vld [vmem:[%s873_s7 + $0x8] sm:$0xff]  }
  0x18   :  { %562 = vmatpush3.bf16.msra.mxu1 %v623_v12  ;;  %v636_v33 = vld [vmem:[%s873_s7 + $0x10] sm:$0xff]   ;;  %v637_v34 = vld [vmem:[%s873_s7 + $0x18] sm:$0xff]   ;;  %v638_v35 = vld [vmem:[%s873_s7 + $0x20] sm:$0xff]  }
  0x19   :  { %563 = vmatprep.subr.bf16.mxu1 %v666_v1  ;;  %574 = vmatpush3.bf16.msra.mxu0 %v627_v16  ;;  %v639_v36 = vld [vmem:[%s873_s7 + $0x28] sm:$0xff]   ;;  %v480_v37 = vld [vmem:[%s870_s4] ss:$0 sm:$0xff]  ;;  %v640_v45 = vld [vmem:[%s873_s7 + $0x30] sm:$0xff]  }
  0x1a   :  { %575 = vmatprep.subr.bf16.mxu0 %v666_v1  ;;  %v641_v46 = vld [vmem:[%s873_s7 + $0x38] sm:$0xff]   ;;  %v489_v47 = vld [vmem:[%s872_s6] ss:$0 sm:$0xff]  ;;  %s642_s6 = scalar_lea.vmem %s467_s25, 128 }
  0x1b   :  { %v498_v55 = vld [vmem:[%s874_s8] ss:$0 sm:$0xff]  ;;  %p643_p0 = scmp.ne.s32.totalorder %s467_s25, %s642_s6  ;;  %p648_p2 = scmp.lt.s32.totalorder %s642_s6, %s642_s6 }
  0x1c   :  { %564 = vmatpush3.bf16.msra.mxu1 %v624_v13 }
  0x1d   :  { %565 = vmatprep.subr.bf16.mxu1 %v666_v1  ;;  %576 = vmatpush3.bf16.msra.mxu0 %v628_v17  ;;  %p649_p3 = por %p648_p2, %p647_p1 }
  0x1e   :  { %577 = vmatprep.subr.bf16.mxu0 %v666_v1 }
  0x1f   :  { %p650_p4 = pnand %p649_p3, %p643_p0 }
  0x20   :  { %566 = vmatpush3.bf16.msra.mxu1 %v625_v14 }
  0x21   :  { %591 = vmatprep.subr.bf16.mxu1 %v666_v1  ;;  %578 = vmatpush3.bf16.msra.mxu0 %v629_v18 }
  0x22   :  { %579 = vmatprep.subr.bf16.mxu0 %v666_v1 }
  0x25   :  { %580 = vmatpush3.bf16.msra.mxu0 %v630_v19 }
  0x26   :  { %581 = vmatprep.subr.bf16.mxu0 %v666_v1 }
  0x29   :  { %582 = vmatpush3.bf16.msra.mxu0 %v631_v20 }
  0x2a   :  { %583 = vmatprep.subr.bf16.mxu0 %v666_v1 }
  0x2d   :  { %584 = vmatpush3.bf16.msra.mxu0 %v632_v29 }
  0x2e   :  { %585 = vmatprep.subr.bf16.mxu0 %v666_v1 }
  0x31   :  { %586 = vmatpush3.bf16.msra.mxu0 %v633_v30 }
  0xe4   :  { %v113_v22 = vpop.f32.mrb[0].mxu0 }
  0xe5   :  { %v114_v23 = vadd.f32 %v474_v21, %v113_v22  ;;  %v549_v24 = vpop.f32.mrb[1].mxu0 }
  0xe6   :  { %v116_v25 = vpop.f32.mrb[2].mxu0 }
  0xe7   :  { %v119_v26 = vmax.f32 %v114_v23, 0.0  ;;  %v550_v27 = vpop.f32.mrb[3].mxu0 }
  0xe9   :  { %v120_v28 = vpack.c.bf16 %v119_v26, %v119_v26 }
  0xeb   :  { %568 = vmatmul.mubr.bf16.vlgmr.msra.gmra.mrb[0].mxu1 %v120_v28 }
  0xec   :  { %607 = vmatprep.mubr.msk.bf16.mxu1 %vm667_vm0, %v666_v1  ;;  %592 = vmatpush3.bf16.msra.mxu1 %v634_v31 }
  0xed   :  { %593 = vmatprep.subr.bf16.mxu1 %v666_v1 }
  0xf0   :  { %594 = vmatpush3.bf16.msra.mxu1 %v635_v32 }
  0xf1   :  { %595 = vmatprep.subr.bf16.mxu1 %v666_v1 }
  0xf4   :  { %596 = vmatpush3.bf16.msra.mxu1 %v636_v33 }
  0xf5   :  { %597 = vmatprep.subr.bf16.mxu1 %v666_v1 }
  0xf8   :  { %598 = vmatpush3.bf16.msra.mxu1 %v637_v34 }
  0xf9   :  { %599 = vmatprep.subr.bf16.mxu1 %v666_v1 }
  0xfc   :  { %600 = vmatpush3.bf16.msra.mxu1 %v638_v35 }
  0xfd   :  { %601 = vmatprep.subr.bf16.mxu1 %v666_v1 }
 0x100   :  { %602 = vmatpush3.bf16.msra.mxu1 %v639_v36 }
 0x101   :  { %603 = vmatprep.subr.bf16.mxu1 %v666_v1 }
 0x104   :  { %604 = vmatpush3.bf16.msra.mxu1 %v640_v45 }
 0x105   :  { %605 = vmatprep.subr.bf16.mxu1 %v666_v1 }
 0x108   :  { %606 = vmatpush3.bf16.msra.mxu1 %v641_v46 }
 0x1be   :  { %v226_v38 = vpop.f32.mrb[0].mxu1 }
 0x1bf   :  { %v227_v39 = vadd.f32 %v480_v37, %v226_v38  ;;  %v569_v40 = vpop.f32.mrb[1].mxu1 }
 0x1c0   :  { %v229_v41 = vpop.f32.mrb[2].mxu1 }
 0x1c1   :  { %v232_v42 = vmax.f32 %v227_v39, 0.0  ;;  %v570_v43 = vpop.f32.mrb[3].mxu1 }
 0x1c3   :  { %v233_v44 = vpack.c.bf16 %v232_v42, %v232_v42 }
 0x1c5   :  { %588 = vmatmul.mubr.bf16.vlgmr.msra.gmra.mrb[4].mxu0 %v233_v44 }
 0x298   :  { %v339_v48 = vpop.f32.mrb[4].mxu0 }
 0x299   :  { %v340_v49 = vadd.f32 %v489_v47, %v339_v48  ;;  %v589_v50 = vpop.f32.mrb[5].mxu0 }
 0x29a   :  { %v342_v51 = vpop.f32.mrb[6].mxu0 }
 0x29b   :  { %v345_v52 = vmax.f32 %v340_v49, 0.0  ;;  %v590_v53 = vpop.f32.mrb[7].mxu0 }
 0x29d   :  { %v346_v54 = vpack.c.bf16 %v345_v52, %v345_v52 }
 0x29f   :  { %608 = vmatmul.mubr.bf16.vlgmr.msra.gmra.mrb[4].mxu1 %v346_v54 }
 0x372   :  { %v452_v56 = vpop.f32.mrb[4].mxu1 }
 0x373   :  { %v453_v57 = vadd.f32 %v498_v55, %v452_v56  ;;  %v609_v58 = vpop.f32.mrb[5].mxu1 }
 0x374   :  { %v455_v59 = vpop.f32.mrb[6].mxu1 }
 0x375   :  { %v610_v60 = vpop.f32.mrb[7].mxu1  ;;  %459 = vst.msk [vmem:[#allocation2] sm:$0xff] %vm458_vm2, %v453_v57 }
 0x376   :  { %653 = shalt.err (!%p650_p4)
}
 0x377   :  { %s654_s8 = scalar_lea.hbm %s875_s9, 128 }
 0x378   :  { %p655_p5 = scmp.ne.s32.totalorder %s875_s9, %s654_s8  ;;  %p658_p6 = scmp.lt.u32.totalorder %s654_s8, %s875_s9 }
 0x37a   :  { %p660_p7 = pnand %p658_p6, %p655_p5 }
 0x37c   :  { %663 = shalt.err (!%p660_p7)
}
 0x37d   :  { %469 = dma.vmem_to_hbm [thread:$0]  %s467_s25, 128, %s875_s9, [#allocation3]  }
 0x37e   :  { %664 = dma.done.wait [#allocation3], 128  }
 0x37f   :  { %665 = vsyncadd [#allocation3], 4294967168 }
 0x380   :  { %473 = vsyncpa [#allocation3], 1 }

</bundles_post_ra>
